<compile_context>
chip_gen: v7x
topology: tpu7x:2x2x1
jax: 0.10.0
libtpu: 0.0.40
codegen_flags: <defaults>
</compile_context>

<pallas_src>
import jax
import jax.numpy as jnp
from jax.experimental import pallas as pl
from jax.experimental.pallas import tpu as pltpu

EPS = 1e-5


# --------------------------------------------------------------------------- #
# Kernel
# --------------------------------------------------------------------------- #
def linear_block_kernel(x_ref, w1_ref, b1_ref, w2_ref, b2_ref, o_ref):
    """One (tm, F) row tile of:  out = x + relu(relu(x@W1+b1) @ W2 + b2)."""
    x = x_ref[...]                                                  # (tm, F) f32

    # stage 1: Linear (BN folded in) -> ReLU   (Dropout == identity in eval)
    h = jnp.dot(x.astype(w1_ref.dtype), w1_ref[...],
                preferred_element_type=jnp.float32)
    h = jnp.maximum(h + b1_ref[...], 0.0)

    # stage 2: Linear (BN folded in) -> ReLU
    h = jnp.dot(h.astype(w2_ref.dtype), w2_ref[...],
                preferred_element_type=jnp.float32)
    h = jnp.maximum(h + b2_ref[...], 0.0)

    # residual
    o_ref[...] = (x + h).astype(o_ref.dtype)


# --------------------------------------------------------------------------- #
# Host-side helpers
# --------------------------------------------------------------------------- #
def fold_bn_into_linear(w, b, gamma, beta, mean, var, eps=EPS,
                        weight_dtype=jnp.bfloat16):
    """Fold eval-mode BatchNorm1d into the preceding Linear layer.

    w: (out, in) as stored by torch.nn.Linear.  Returns the effective
    transposed weight (in, out) in `weight_dtype` (bf16 = MXU-native) and the
    f32 bias (1, out) such that  x @ w_eff + b_eff == BN(x @ w.T + b)  (eval).
    """
    scale = gamma * jax.lax.rsqrt(var + eps)            # (out,)
    w_eff = (w * scale[:, None]).T                      # (in, out)
    b_eff = ((b - mean) * scale + beta)[None, :]        # (1, out)
    return w_eff.astype(weight_dtype), b_eff.astype(jnp.float32)


def _device_kind():
    try:
        return jax.devices()[0].device_kind.lower()
    except Exception:
        return ""


def _num_tensorcores():
    # v7x has 2 TensorCores per device; v4 / v5p megacore likewise.  v5e/v6e: 1.
    kind = _device_kind()
    return 2 if any(t in kind for t in ("v7", "v4", "v5p")) else 1


def _vmem_capacity_bytes():
    try:
        return int(pltpu.get_tpu_info().vmem_capacity_bytes)
    except Exception:
        kind = _device_kind()
        return (64 << 20) if "v7" in kind else (128 << 20)


def _pick_tm(n_rows, requested, num_cores):
    if requested is not None:
        tm = requested
    else:
        # Mem-bound at small F: biggest row tile that fits comfortably.
        tm = min(n_rows, 512)
        # Make sure the 'parallel' axis has >= num_cores steps so every
        # TensorCore gets work (matters on v7x; no-op on v5e/v6e).
        if num_cores > 1 and n_rows >= num_cores * 8:
            tm = min(tm, n_rows // num_cores)
    tm = max(8, tm - tm % 8)            # sublane-aligned
    return tm


def _build_specs(tm, F, single_buffer_consts):
    row_spec = pl.BlockSpec((tm, F), lambda i: (i, 0))
    # Weights / biases have a constant index_map (fetched once); request single
    # buffering so they are not needlessly double-buffered in VMEM.
    kw = {"pipeline_mode": pl.Buffered(1)} if single_buffer_consts else {}
    mat_spec = pl.BlockSpec((F, F), lambda i: (0, 0), **kw)
    vec_spec = pl.BlockSpec((1, F), lambda i: (0, 0), **kw)
    return row_spec, mat_spec, vec_spec


def linear_block(x, folded_params, *, tm=None):
    """x: (N, F);  folded_params = (w1_eff, b1_eff, w2_eff, b2_eff)."""
    w1, b1, w2, b2 = folded_params
    N, F = x.shape
    assert F % 128 == 0, "kernel assumes lane dim (linear_size) % 128 == 0"

    num_cores = _num_tensorcores()
    tm = _pick_tm(N, tm, num_cores)

    # Pad the batch so every row tile is full; padded rows are discarded after
    # the call (keeps the large-tile fast path for any N).
    n_pad = pl.cdiv(N, tm) * tm
    x_in = jnp.pad(x, ((0, n_pad - N), (0, 0))) if n_pad != N else x
    grid = (n_pad // tm,)

    itemsize = jnp.dtype(x.dtype).itemsize
    wsize = jnp.dtype(w1.dtype).itemsize

    cost = pl.CostEstimate(
        flops=4 * n_pad * F * F,                               # two (N,F)x(F,F)
        transcendentals=0,
        bytes_accessed=2 * n_pad * F * itemsize + 2 * F * F * wsize + 2 * F * 4)

    vmem_cap = _vmem_capacity_bytes()

    def call(single_buffer_consts):
        row_spec, mat_spec, vec_spec = _build_specs(tm, F, single_buffer_consts)
        wbufs = 1 if single_buffer_consts else 2
        vmem_need = (2 * F * F * wsize * wbufs        # two weight matrices
                     + 2 * F * 4 * wbufs              # two bias rows (f32)
                     + 2 * 2 * tm * F * itemsize      # x / o tiles, double-buffered
                     + 2 * tm * F * 4)                # live f32 intermediates
        # Explicit, generation-aware budget: <= 75% of physical VMEM.
        vmem_limit = int(min(max(2 * vmem_need, 4 << 20), (3 * vmem_cap) // 4))
        return pl.pallas_call(
            linear_block_kernel,
            out_shape=jax.ShapeDtypeStruct((n_pad, F), x.dtype),
            grid=grid,
            in_specs=[row_spec, mat_spec, vec_spec, mat_spec, vec_spec],
            out_specs=row_spec,
            compiler_params=pltpu.CompilerParams(
                dimension_semantics=("parallel",),    # batch blocks shard across TCs
                vmem_limit_bytes=vmem_limit),
            cost_estimate=cost,
        )(x_in, w1, b1, w2, b2)

    if hasattr(pl, "Buffered"):
        try:
            out = call(single_buffer_consts=True)
        except (TypeError, NotImplementedError, pltpu.LoweringException):
            # pipeline_mode=pl.Buffered(1) not supported by this jax build ->
            # default double buffering.  Real errors (e.g. VMEM OOM) propagate.
            out = call(single_buffer_consts=False)
    else:
        out = call(single_buffer_consts=False)

    return out[:N] if n_pad != N else out


# --------------------------------------------------------------------------- #
# Pure-JAX references
# --------------------------------------------------------------------------- #
def reference_fp32(x, raw_params):
    """Original (unfolded) eval-mode forward, all f32."""
    (w1, b1, g1, be1, m1, v1, w2, b2, g2, be2, m2, v2) = raw_params
    h = x @ w1.T + b1
    h = (h - m1) * jax.lax.rsqrt(v1 + EPS) * g1 + be1
    h = jnp.maximum(h, 0.0)
    h = h @ w2.T + b2
    h = (h - m2) * jax.lax.rsqrt(v2 + EPS) * g2 + be2
    h = jnp.maximum(h, 0.0)
    return x + h


def reference_folded(x, folded_params):
    """Same math as the kernel (bf16 weights, f32 accumulation)."""
    w1, b1, w2, b2 = folded_params
    h = jnp.dot(x.astype(w1.dtype), w1, preferred_element_type=jnp.float32) + b1
    h = jnp.maximum(h, 0.0)
    h = jnp.dot(h.astype(w2.dtype), w2, preferred_element_type=jnp.float32) + b2
    h = jnp.maximum(h, 0.0)
    return x + h


if __name__ == "__main__":
    N, F = 16, 128            # batch, linear_size (toy shapes)
    key = jax.random.PRNGKey(0)
    ks = jax.random.split(key, 13)

    bound = 1.0 / float(F) ** 0.5
    # PyTorch nn.Linear stores weight as (out, in).
    w1 = jax.random.uniform(ks[0], (F, F), jnp.float32, -bound, bound)
    b1 = jax.random.uniform(ks[1], (F,), jnp.float32, -bound, bound)
    w2 = jax.random.uniform(ks[2], (F, F), jnp.float32, -bound, bound)
    b2 = jax.random.uniform(ks[3], (F,), jnp.float32, -bound, bound)

    g1 = jax.random.uniform(ks[4], (F,), jnp.float32, 0.5, 1.5)
    be1 = jax.random.normal(ks[5], (F,), jnp.float32) * 0.1
    m1 = jax.random.normal(ks[6], (F,), jnp.float32) * 0.1
    v1 = jax.random.uniform(ks[7], (F,), jnp.float32, 0.5, 1.5)
    g2 = jax.random.uniform(ks[8], (F,), jnp.float32, 0.5, 1.5)
    be2 = jax.random.normal(ks[9], (F,), jnp.float32) * 0.1
    m2 = jax.random.normal(ks[10], (F,), jnp.float32) * 0.1
    v2 = jax.random.uniform(ks[11], (F,), jnp.float32, 0.5, 1.5)

    x = jax.random.normal(ks[12], (N, F), jnp.float32)

    raw_params = (w1, b1, g1, be1, m1, v1, w2, b2, g2, be2, m2, v2)
    folded_params = (*fold_bn_into_linear(w1, b1, g1, be1, m1, v1),
                     *fold_bn_into_linear(w2, b2, g2, be2, m2, v2))

    out = jax.block_until_ready(linear_block(x, folded_params))

    assert out.shape == (N, F) and out.dtype == jnp.float32

    # Tight check vs. a JAX reference doing the identical folded/bf16 math.
    ref_f = reference_folded(x, folded_params)
    assert jnp.allclose(out, ref_f, atol=2e-3, rtol=2e-3), \
        float(jnp.max(jnp.abs(out - ref_f)))

    # Loose check vs. the original all-f32 eval-mode forward (bf16 weight
    # rounding is the only source of difference).
    ref32 = reference_fp32(x, raw_params)
    assert jnp.allclose(out, ref32, atol=5e-2, rtol=5e-2), \
        float(jnp.max(jnp.abs(out - ref32)))

    print("KERNEL_OK")
</pallas_src>

<mosaic_0001>
module attributes {stable_mosaic.version = 11 : i64} {
  func.func @linear_block_kernel(%arg0: i32, %arg1: memref<16x128xf32, #tpu.memory_space<vmem>>, %arg2: memref<128x128xbf16, #tpu.memory_space<vmem>>, %arg3: memref<1x128xf32, #tpu.memory_space<vmem>>, %arg4: memref<128x128xbf16, #tpu.memory_space<vmem>>, %arg5: memref<1x128xf32, #tpu.memory_space<vmem>>, %arg6: memref<16x128xf32, #tpu.memory_space<vmem>>) attributes {dimension_semantics = [#tpu.dimension_semantics<parallel>], iteration_bounds = array<i64: 1>, scalar_prefetch = 0 : i64, scratch_operands = 0 : i64, tpu.core_type = #tpu.core_type<tc>, window_params = [{transform_indices = @transform_0, window_bounds = array<i64: 16, 128>}, {pipeline_mode = #tpu.pipeline_mode<synchronous>, transform_indices = @transform_1, window_bounds = array<i64: 128, 128>}, {pipeline_mode = #tpu.pipeline_mode<synchronous>, transform_indices = @transform_2, window_bounds = array<i64: 1, 128>}, {pipeline_mode = #tpu.pipeline_mode<synchronous>, transform_indices = @transform_3, window_bounds = array<i64: 128, 128>}, {pipeline_mode = #tpu.pipeline_mode<synchronous>, transform_indices = @transform_4, window_bounds = array<i64: 1, 128>}, {transform_indices = @transform_5, window_bounds = array<i64: 16, 128>}]} {
    %c0 = arith.constant 0 : index
    %c0_0 = arith.constant 0 : index
    %0 = vector.load %arg1[%c0, %c0_0] : memref<16x128xf32, #tpu.memory_space<vmem>>, vector<16x128xf32>
    %1 = arith.truncf %0 : vector<16x128xf32> to vector<16x128xbf16>
    %c0_1 = arith.constant 0 : index
    %c0_2 = arith.constant 0 : index
    %2 = vector.load %arg2[%c0_1, %c0_2] : memref<128x128xbf16, #tpu.memory_space<vmem>>, vector<128x128xbf16>
    %cst = arith.constant dense<0.000000e+00> : vector<16x128xf32>
    %3 = tpu.matmul %1, %2, %cst {dimension_numbers = #tpu.dot_dimension_numbers<[1], [0], [0], [1], [0, 0, 1, 1], [], []>} : vector<16x128xbf16>, vector<128x128xbf16>, vector<16x128xf32> -> vector<16x128xf32>
    %c0_3 = arith.constant 0 : index
    %c0_4 = arith.constant 0 : index
    %4 = vector.load %arg3[%c0_3, %c0_4] : memref<1x128xf32, #tpu.memory_space<vmem>>, vector<1x128xf32>
    %5 = vector.broadcast %4 : vector<1x128xf32> to vector<16x128xf32>
    %6 = arith.addf %3, %5 : vector<16x128xf32>
    %cst_5 = arith.constant 0.000000e+00 : f32
    %7 = vector.broadcast %cst_5 : f32 to vector<16x128xf32>
    %8 = arith.maximumf %6, %7 : vector<16x128xf32>
    %9 = arith.truncf %8 : vector<16x128xf32> to vector<16x128xbf16>
    %c0_6 = arith.constant 0 : index
    %c0_7 = arith.constant 0 : index
    %10 = vector.load %arg4[%c0_6, %c0_7] : memref<128x128xbf16, #tpu.memory_space<vmem>>, vector<128x128xbf16>
    %cst_8 = arith.constant dense<0.000000e+00> : vector<16x128xf32>
    %11 = tpu.matmul %9, %10, %cst_8 {dimension_numbers = #tpu.dot_dimension_numbers<[1], [0], [0], [1], [0, 0, 1, 1], [], []>} : vector<16x128xbf16>, vector<128x128xbf16>, vector<16x128xf32> -> vector<16x128xf32>
    %c0_9 = arith.constant 0 : index
    %c0_10 = arith.constant 0 : index
    %12 = vector.load %arg5[%c0_9, %c0_10] : memref<1x128xf32, #tpu.memory_space<vmem>>, vector<1x128xf32>
    %13 = vector.broadcast %12 : vector<1x128xf32> to vector<16x128xf32>
    %14 = arith.addf %11, %13 : vector<16x128xf32>
    %cst_11 = arith.constant 0.000000e+00 : f32
    %15 = vector.broadcast %cst_11 : f32 to vector<16x128xf32>
    %16 = arith.maximumf %14, %15 : vector<16x128xf32>
    %17 = arith.addf %0, %16 : vector<16x128xf32>
    %c0_12 = arith.constant 0 : index
    %c0_13 = arith.constant 0 : index
    %18 = vector.load %arg6[%c0_12, %c0_13] : memref<16x128xf32, #tpu.memory_space<vmem>>, vector<16x128xf32>
    tpu.vector_store %arg6[%c0_12, %c0_13], %17 {strides = array<i32>} : memref<16x128xf32, #tpu.memory_space<vmem>>, vector<16x128xf32>,
    return
  }
  func.func @transform_0(%arg0: i32) -> (i32, i32) {
    %c0_i32 = arith.constant 0 : i32
    %c0_i32_0 = arith.constant 0 : i32
    return %arg0, %c0_i32 : i32, i32
  }
  func.func @transform_1(%arg0: i32) -> (i32, i32) {
    %c0_i32 = arith.constant 0 : i32
    %c0_i32_0 = arith.constant 0 : i32
    %c0_i32_1 = arith.constant 0 : i32
    return %c0_i32, %c0_i32_0 : i32, i32
  }
  func.func @transform_2(%arg0: i32) -> (i32, i32) {
    %c0_i32 = arith.constant 0 : i32
    %c0_i32_0 = arith.constant 0 : i32
    %c0_i32_1 = arith.constant 0 : i32
    return %c0_i32, %c0_i32_0 : i32, i32
  }
  func.func @transform_3(%arg0: i32) -> (i32, i32) {
    %c0_i32 = arith.constant 0 : i32
    %c0_i32_0 = arith.constant 0 : i32
    %c0_i32_1 = arith.constant 0 : i32
    return %c0_i32, %c0_i32_0 : i32, i32
  }
  func.func @transform_4(%arg0: i32) -> (i32, i32) {
    %c0_i32 = arith.constant 0 : i32
    %c0_i32_0 = arith.constant 0 : i32
    %c0_i32_1 = arith.constant 0 : i32
    return %c0_i32, %c0_i32_0 : i32, i32
  }
  func.func @transform_5(%arg0: i32) -> (i32, i32) {
    %c0_i32 = arith.constant 0 : i32
    %c0_i32_0 = arith.constant 0 : i32
    return %arg0, %c0_i32 : i32, i32
  }
}

</mosaic_0001>

<bundles_post_ra>
// kernel: tpu_custom_call.1
= control target key start
LH: loop header
LB: loop body
LE: loop exit
PB: predicated region body
PF: predicated region fallthrough
CT: control target
= control target key end

     0   :  { %10 = vsyncpa [#allocation3], 0  ;;  %s619_s0 = inlined_call_operand.hbm [shape: f32[16,128], index: 0, kind: input, shape index: {}]   ;;  %s620_s1 = inlined_call_operand.hbm [shape: bf16[128,128], index: 1, kind: input, shape index: {}]   ;;  %s621_s2 = inlined_call_operand.vmem [shape: f32[1,128], index: 2, kind: input, shape index: {}]   ;;  %s622_s3 = inlined_call_operand.hbm [shape: bf16[128,128], index: 3, kind: input, shape index: {}]   ;;  %s623_s4 = inlined_call_operand.vmem [shape: f32[1,128], index: 4, kind: input, shape index: {}]   ;;  %s624_s5 = inlined_call_operand.hbm [shape: f32[16,128], index: 5, kind: output, shape index: {}]  }
   0x1   :  { %11 = vsyncpa [#allocation6], 0 }
   0x2   :  { %12 = vsyncpa [#allocation4], 0  ;;  %s513_s18 = smov [#allocation5]   ;;  %s419_s22 = scalar_lea.hbm %s620_s1, 1024 }
   0x3   :  { %s30_s19 = sshll.u32 %s513_s18, 4  ;;  %p420_p0 = scmp.ne.s32.totalorder %s620_s1, %s419_s22  ;;  %s31_s19 = int_to_ptr.vmem [resolvable:$true] %s30_s19 }
   0x4   :  { %p423_p1 = scmp.lt.u32.totalorder %s419_s22, %s620_s1 }
   0x6   :  { %p425_p2 = pnand %p423_p1, %p420_p0 }
   0x8   :  { %428 = shalt.err (!%p425_p2)
}
   0x9   :  { %s429_s27 = scalar_lea.vmem %s31_s19, 1024  ;;  %p434_p4 = scmp.lt.s32.totalorder %s31_s19, %s31_s19 }
   0xa   :  { %p430_p3 = scmp.ne.s32.totalorder %s31_s19, %s429_s27  ;;  %p435_p5 = scmp.lt.s32.totalorder %s429_s27, %s429_s27 }
   0xc   :  { %p436_p6 = por %p435_p5, %p434_p4 }
   0xe   :  { %p437_p7 = pnand %p436_p6, %p430_p3 }
  0x10   :  { %440 = shalt.err (!%p437_p7)
}
  0x11   :  { %s514_s28 = smov 64   ;;  %s515_s29 = smov 4  }
  0x12   :  { %36 = dma.hbm_to_vmem [thread:$0]  %s620_s1, 1024, %s31_s19, [#allocation6], %s514_s28, %s514_s28, %s515_s29  }
  0x13   :  { %s516_s7 = smov [#allocation2]   ;;  %s441_s11 = scalar_lea.hbm %s619_s0, 256 }
  0x14   :  { %s18_s8 = sshll.u32 %s516_s7, 4  ;;  %p442_p8 = scmp.ne.s32.totalorder %s619_s0, %s441_s11  ;;  %s19_s8 = int_to_ptr.vmem [resolvable:$true] %s18_s8 }
  0x15   :  { %p445_p9 = scmp.lt.u32.totalorder %s441_s11, %s619_s0 }
  0x17   :  { %p447_p10 = pnand %p445_p9, %p442_p8 }
  0x19   :  { %450 = shalt.err (!%p447_p10)
}
  0x1a   :  { %s451_s16 = scalar_lea.vmem %s19_s8, 256  ;;  %p456_p12 = scmp.lt.s32.totalorder %s19_s8, %s19_s8 }
  0x1b   :  { %p452_p11 = scmp.ne.s32.totalorder %s19_s8, %s451_s16  ;;  %p457_p13 = scmp.lt.s32.totalorder %s451_s16, %s451_s16 }
  0x1d   :  { %p458_p0 = por %p457_p13, %p456_p12 }
  0x1f   :  { %p459_p1 = pnand %p458_p0, %p452_p11 }
  0x21   :  { %462 = shalt.err (!%p459_p1)
}
  0x22   :  { %s517_s1 = smov 128   ;;  %s518_s17 = smov 8  }
  0x23   :  { %24 = dma.hbm_to_vmem [thread:$0]  %s619_s0, 256, %s19_s8, [#allocation3], %s517_s1, %s517_s1, %s518_s17  }
  0x24   :  { %s519_s20 = smov [#allocation7]   ;;  %s463_s24 = scalar_lea.hbm %s622_s3, 1024 }
  0x25   :  { %s44_s21 = sshll.u32 %s519_s20, 4  ;;  %p464_p2 = scmp.ne.s32.totalorder %s622_s3, %s463_s24  ;;  %s45_s21 = int_to_ptr.vmem [resolvable:$true] %s44_s21 }
  0x26   :  { %p467_p3 = scmp.lt.u32.totalorder %s463_s24, %s622_s3 }
  0x28   :  { %p469_p4 = pnand %p467_p3, %p464_p2 }
  0x2a   :  { %472 = shalt.err (!%p469_p4)
}
  0x2b   :  { %s473_s6 = scalar_lea.vmem %s45_s21, 1024  ;;  %p478_p6 = scmp.lt.s32.totalorder %s45_s21, %s45_s21 }
  0x2c   :  { %p474_p5 = scmp.ne.s32.totalorder %s45_s21, %s473_s6  ;;  %p479_p7 = scmp.lt.s32.totalorder %s473_s6, %s473_s6 }
  0x2e   :  { %p480_p8 = por %p479_p7, %p478_p6 }
  0x30   :  { %p481_p9 = pnand %p480_p8, %p474_p5 }
  0x32   :  { %484 = shalt.err (!%p481_p9)
}
  0x33   :  { %50 = dma.hbm_to_vmem [thread:$0]  %s622_s3, 1024, %s45_s21, [#allocation6], %s514_s28, %s514_s28, %s515_s29  }
  0x34   :  { %507 = dma.done.wait [#allocation3], 256  }
  0x35   :  { %508 = vsyncadd [#allocation3], 4294967040 }
  0x36   :  { %509 = dma.done.wait [#allocation6], 2048  }
  0x37   :  { %510 = vsyncadd [#allocation6], 4294965248  ;;  %v520_v0 = vmov 0.0   ;;  %vm521_vm0 = vmmov 0   ;;  %v403_v1 = vld [vmem:[#allocation5] sm:$0xff]   ;;  %v404_v2 = vld [vmem:[#allocation5 + $0x8] sm:$0xff]  }
  0x38   :  { %353 = vmatprep.subr.bf16.mxu0 %v520_v0  ;;  %369 = vmatprep.mubr.msk.bf16.mxu0 %vm521_vm0, %v520_v0  ;;  %v405_v3 = vld [vmem:[#allocation5 + $0x10] sm:$0xff]   ;;  %v411_v4 = vld [vmem:[#allocation7] sm:$0xff]   ;;  %v406_v5 = vld [vmem:[#allocation5 + $0x18] sm:$0xff]  }
  0x39   :  { %373 = vmatprep.subr.bf16.mxu1 %v520_v0  ;;  %389 = vmatprep.mubr.msk.bf16.mxu1 %vm521_vm0, %v520_v0  ;;  %v412_v6 = vld [vmem:[#allocation7 + $0x8] sm:$0xff]   ;;  %v407_v7 = vld [vmem:[#allocation5 + $0x20] sm:$0xff]   ;;  %v413_v8 = vld [vmem:[#allocation7 + $0x10] sm:$0xff]  }
  0x3a   :  { %354 = vmatpush3.bf16.msra.mxu0 %v403_v1  ;;  %374 = vmatpush3.bf16.msra.mxu1 %v411_v4  ;;  %v408_v9 = vld [vmem:[#allocation5 + $0x28] sm:$0xff]   ;;  %v414_v10 = vld [vmem:[#allocation7 + $0x18] sm:$0xff]   ;;  %v409_v11 = vld [vmem:[#allocation5 + $0x30] sm:$0xff]  }
  0x3b   :  { %355 = vmatprep.subr.bf16.mxu0 %v520_v0  ;;  %375 = vmatprep.subr.bf16.mxu1 %v520_v0  ;;  %v415_v12 = vld [vmem:[#allocation7 + $0x20] sm:$0xff]   ;;  %v410_v13 = vld [vmem:[#allocation5 + $0x38] sm:$0xff]   ;;  %v63_v14 = vld [vmem:[#allocation2] sm:$0xff] }
  0x3c   :  { %v64_v15 = vld [vmem:[#allocation2 + $0x8] sm:$0xff]  ;;  %v416_v16 = vld [vmem:[#allocation7 + $0x28] sm:$0xff]   ;;  %v417_v18 = vld [vmem:[#allocation7 + $0x30] sm:$0xff]  }
  0x3d   :  { %v65_v17 = vpack.c.bf16 %v64_v15, %v63_v14  ;;  %v418_v19 = vld [vmem:[#allocation7 + $0x38] sm:$0xff]   ;;  %v317_v20 = vld [vmem:[%s621_s2] ss:$0 sm:$0xff]  ;;  %s522_s2 = smov [#allocation8]  }
  0x3e   :  { %356 = vmatpush3.bf16.msra.mxu0 %v404_v2  ;;  %376 = vmatpush3.bf16.msra.mxu1 %v412_v6  ;;  %v326_v30 = vld [vmem:[%s623_s4] ss:$0 sm:$0xff]  ;;  %s304_s9 = sshll.u32 %s522_s2, 4  ;;  %s305_s9 = int_to_ptr.vmem [resolvable:$true] %s304_s9 }
  0x3f   :  { %357 = vmatprep.subr.bf16.mxu0 %v520_v0  ;;  %377 = vmatprep.subr.bf16.mxu1 %v520_v0  ;;  %s485_s10 = scalar_lea.vmem %s305_s9, 256  ;;  %p490_p11 = scmp.lt.s32.totalorder %s305_s9, %s305_s9 }
  0x40   :  { %p486_p10 = scmp.ne.s32.totalorder %s305_s9, %s485_s10  ;;  %p491_p12 = scmp.lt.s32.totalorder %s485_s10, %s485_s10 }
  0x42   :  { %358 = vmatpush3.bf16.msra.mxu0 %v405_v3  ;;  %378 = vmatpush3.bf16.msra.mxu1 %v413_v8  ;;  %p492_p13 = por %p491_p12, %p490_p11 }
  0x43   :  { %359 = vmatprep.subr.bf16.mxu0 %v520_v0  ;;  %379 = vmatprep.subr.bf16.mxu1 %v520_v0 }
  0x44   :  { %p493_p0 = pnand %p492_p13, %p486_p10 }
  0x46   :  { %360 = vmatpush3.bf16.msra.mxu0 %v406_v5  ;;  %380 = vmatpush3.bf16.msra.mxu1 %v414_v10 }
  0x47   :  { %361 = vmatprep.subr.bf16.mxu0 %v520_v0  ;;  %381 = vmatprep.subr.bf16.mxu1 %v520_v0 }
  0x4a   :  { %362 = vmatpush3.bf16.msra.mxu0 %v407_v7  ;;  %382 = vmatpush3.bf16.msra.mxu1 %v415_v12 }
  0x4b   :  { %363 = vmatprep.subr.bf16.mxu0 %v520_v0  ;;  %383 = vmatprep.subr.bf16.mxu1 %v520_v0 }
  0x4e   :  { %364 = vmatpush3.bf16.msra.mxu0 %v408_v9  ;;  %384 = vmatpush3.bf16.msra.mxu1 %v416_v16 }
  0x4f   :  { %365 = vmatprep.subr.bf16.mxu0 %v520_v0  ;;  %385 = vmatprep.subr.bf16.mxu1 %v520_v0 }
  0x52   :  { %366 = vmatpush3.bf16.msra.mxu0 %v409_v11  ;;  %386 = vmatpush3.bf16.msra.mxu1 %v417_v18 }
  0x53   :  { %367 = vmatprep.subr.bf16.mxu0 %v520_v0  ;;  %387 = vmatprep.subr.bf16.mxu1 %v520_v0 }
  0x56   :  { %368 = vmatpush3.bf16.msra.mxu0 %v410_v13  ;;  %388 = vmatpush3.bf16.msra.mxu1 %v418_v19 }
  0x59   :  { %370 = vmatmul.mubr.bf16.vlgmr.msra.gmra.mrb[0].mxu0 %v65_v17 }
 0x12c   :  { %v171_v21 = vpop.f32.mrb[0].mxu0 }
 0x12d   :  { %v172_v22 = vadd.f32 %v317_v20, %v171_v21  ;;  %v371_v23 = vpop.f32.mrb[1].mxu0 }
 0x12e   :  { %v174_v24 = vpop.f32.mrb[2].mxu0 }
 0x12f   :  { %v175_v25 = vadd.f32 %v317_v20, %v174_v24  ;;  %v372_v26 = vpop.f32.mrb[3].mxu0  ;;  %v178_v27 = vmax.f32 %v172_v22, 0.0 }
 0x131   :  { %v179_v28 = vmax.f32 %v175_v25, 0.0 }
 0x133   :  { %v180_v29 = vpack.c.bf16 %v179_v28, %v178_v27 }
 0x135   :  { %390 = vmatmul.mubr.bf16.vlgmr.msra.gmra.mrb[0].mxu1 %v180_v29 }
 0x208   :  { %v286_v31 = vpop.f32.mrb[0].mxu1 }
 0x209   :  { %v287_v32 = vadd.f32 %v326_v30, %v286_v31  ;;  %v391_v33 = vpop.f32.mrb[1].mxu1 }
 0x20a   :  { %v289_v34 = vpop.f32.mrb[2].mxu1 }
 0x20b   :  { %v293_v35 = vmax.f32 %v287_v32, 0.0  ;;  %v290_v36 = vadd.f32 %v326_v30, %v289_v34  ;;  %v392_v37 = vpop.f32.mrb[3].mxu1 }
 0x20d   :  { %v295_v38 = vadd.f32 %v293_v35, %v63_v14  ;;  %v294_v39 = vmax.f32 %v290_v36, 0.0 }
 0x20f   :  { %297 = vst [vmem:[#allocation8] sm:$0xff] %v295_v38  ;;  %v296_v40 = vadd.f32 %v294_v39, %v64_v15 }
 0x211   :  { %298 = vst [vmem:[#allocation8 + $0x8] sm:$0xff] %v296_v40 }
 0x212   :  { %496 = shalt.err (!%p493_p0)
}
 0x213   :  { %s497_s12 = scalar_lea.hbm %s624_s5, 256 }
 0x214   :  { %p498_p1 = scmp.ne.s32.totalorder %s624_s5, %s497_s12  ;;  %p501_p2 = scmp.lt.u32.totalorder %s497_s12, %s624_s5 }
 0x216   :  { %p503_p3 = pnand %p501_p2, %p498_p1 }
 0x218   :  { %506 = shalt.err (!%p503_p3)
}
 0x219   :  { %310 = dma.vmem_to_hbm [thread:$0]  %s305_s9, 256, %s624_s5, [#allocation4], %s517_s1, %s517_s1, %s518_s17  }
 0x21a   :  { %511 = dma.done.wait [#allocation4], 256  }
 0x21b   :  { %512 = vsyncadd [#allocation4], 4294967040 }
 0x21c   :  { %314 = vsyncpa [#allocation3], 1 }
 0x21d   :  { %315 = vsyncpa [#allocation6], 1 }
 0x21e   :  { %316 = vsyncpa [#allocation4], 1 }

</bundles_post_ra>
